<compile_context>
chip_gen: v7x
topology: tpu7x:2x2x1
jax: 0.10.0
libtpu: 0.0.40
codegen_flags: <defaults>
</compile_context>

<pallas_src>
import jax
import jax.numpy as jnp
from jax.experimental import pallas as pl
from jax.experimental.pallas import tpu as pltpu


def ornet_kernel(x_ref, w_ref, b_ref, dm_ref, e_ref, out_ref):
    x = x_ref[...].astype(jnp.float32)       # (tb, F)  streamed batch tile
    w = w_ref[...]                           # (KP, F)  f32, VMEM-resident
    b = b_ref[...]                           # (KP, 1)  f32 threshold column
    dm = dm_ref[...]                         # (K, KP)  f32 +/-1 difference mat
    e0 = e_ref[...]                          # (K, 1)   f32 [1, 0, ..., 0]

    # z = x @ W^T, laid out lane-dense along the batch: NT matmul on the
    # (otherwise idle) MXU, (KP, F) x (tb, F)^T -> (KP, tb).  Every row of the
    # result equals z (w is row-replicated), so no relayout / broadcast of a
    # (tb, 1) column is needed.
    z = jax.lax.dot_general(
        w, x, (((1,), (1,)), ((), ())), preferred_element_type=jnp.float32)

    # One sigmoid (EUP) for all thresholds; rows >= K-1 are padding (bias 0)
    # and are zeroed out by the difference matrix below.
    s = jax.nn.sigmoid(b + z)                # (KP, tb)

    # d[j] = p[j] - p[j+1] with p = [1, s_0 .. s_{K-2}, 0], expressed as a
    # constant difference matrix on the MXU: d = D @ s + e0.  Coefficients are
    # 0 / +-1, so this is exact and replaces a second sigmoid or sublane roll.
    d = jax.lax.dot_general(
        dm, s, (((1,), (0,)), ((), ())), preferred_element_type=jnp.float32)
    d = d + e0                               # (K, tb)

    # log(d / (1 - d)) without a VALU f32 divide: two EUP logs + VPU subtract.
    out_ref[...] = jnp.log(d) - jnp.log(1.0 - d)


def _auto_tile_b(batch, in_features, x_itemsize, nclass):
    """Largest lane-aligned batch tile that fits the scoped-VMEM budget."""
    LANE = 128
    # Budget: double-buffered x block + double-buffered (sublane-padded)
    # output block under ~12 MiB -> fits v5e's 16 MiB default scoped-VMEM
    # limit (the tightest default across v5e/v6e/v7x) and v7x's 64 MiB
    # physical VMEM with headroom.
    budget = 12 << 20
    out_col_bytes = ((nclass + 7) // 8) * 8 * 4       # (K, tb) f32, padded to 8 rows
    per_row = 2 * in_features * x_itemsize + 2 * out_col_bytes
    tb = max(LANE, (budget // per_row) // LANE * LANE)
    # v7x megacore: keep at least two grid steps (the grid axis is "parallel")
    # so the second TensorCore gets work; no effect on v5e/v6e (one core).
    if batch > LANE:
        half = (((batch + 1) // 2) + LANE - 1) // LANE * LANE
        tb = min(tb, half)
    return tb if batch > tb else batch


def ornet_forward(x, w, or_bias, *, tile_b=None):
    """ORNet forward.  x: (B, F), w: (1, F), or_bias: (K-1,) -> (B, K) f32."""
    B, F = x.shape
    Km1 = int(or_bias.shape[0])
    K = Km1 + 1
    KP = ((Km1 + 7) // 8) * 8                 # sublane-padded threshold count

    # Batch tile (lane dim of the output block): multiple of 128 unless it
    # covers the whole batch.
    if tile_b is None:
        tb = _auto_tile_b(B, F, x.dtype.itemsize, K)
    elif B <= tile_b:
        tb = B
    else:
        tb = (int(tile_b) // 128) * 128
        if tb == 0:
            raise ValueError(
                "tile_b must be >= 128 when batch > tile_b (the output lane "
                "dim must be a multiple of 128)")
    grid = (pl.cdiv(B, tb),)

    # VMEM-resident parameters stay in f32 regardless of x's dtype.
    w_f32 = w.astype(jnp.float32).reshape(1, F)
    w_rep = jnp.broadcast_to(w_f32, (KP, F))                     # (KP, F)
    b_col = jnp.zeros((KP, 1), jnp.float32).at[:Km1, 0].set(
        or_bias.astype(jnp.float32))                             # (KP, 1)
    dmat = jnp.zeros((K, KP), jnp.float32)
    dmat = dmat.at[jnp.arange(Km1), jnp.arange(Km1)].set(-1.0)   # -s_j  at row j
    dmat = dmat.at[jnp.arange(1, K), jnp.arange(Km1)].set(1.0)   # +s_{j-1} at row j
    e0 = jnp.zeros((K, 1), jnp.float32).at[0, 0].set(1.0)        # (K, 1)

    out_kb = pl.pallas_call(
        ornet_kernel,
        out_shape=jax.ShapeDtypeStruct((K, B), jnp.float32),
        grid_spec=pltpu.PrefetchScalarGridSpec(
            num_scalar_prefetch=0,
            grid=grid,
            in_specs=[
                pl.BlockSpec((tb, F), lambda i: (i, 0)),   # x: batch-tiled
                pl.BlockSpec((KP, F), lambda i: (0, 0)),   # w (replicated): resident
                pl.BlockSpec((KP, 1), lambda i: (0, 0)),   # bias column: resident
                pl.BlockSpec((K, KP), lambda i: (0, 0)),   # difference matrix
                pl.BlockSpec((K, 1), lambda i: (0, 0)),    # e0 = [1,0,...,0]
            ],
            out_specs=pl.BlockSpec((K, tb), lambda i: (0, i)),   # lane-dense batch
        ),
        compiler_params=pltpu.CompilerParams(
            dimension_semantics=("parallel",)),
    )(x, w_rep, b_col, dmat, e0)

    # Module semantics are (B, K); the transpose of the small (K, B) slab is
    # cheap layout plumbing.  Callers that can consume (K, B) directly should
    # use out_kb and skip it.
    return out_kb.T


def ornet_reference(x, w, or_bias):
    """Pure-JAX reference mirroring the PyTorch forward (exact f32 math)."""
    xf = x.astype(jnp.float32)
    wf = w.astype(jnp.float32)
    z = jnp.sum(xf * wf[0][None, :], axis=-1, keepdims=True)      # (B, 1)
    y = jax.nn.sigmoid(or_bias.astype(jnp.float32)[None, :] + z)  # (B, K-1)
    p = jnp.concatenate(
        [jnp.ones((x.shape[0], 1), jnp.float32), y,
         jnp.zeros((x.shape[0], 1), jnp.float32)], axis=1)
    d = p[:, :-1] - p[:, 1:]
    return jnp.log(d / (1.0 - d))


if __name__ == "__main__":
    # Small shapes consistent with the module: in_features=32, nclass=5.
    in_features = 32
    nclass = 5
    batch = 8

    key = jax.random.PRNGKey(0)
    kx, kw, kb = jax.random.split(key, 3)

    # bf16-quantized f32 test data: exactly representable under whichever
    # multi-pass scheme the MXU uses for the f32 projection, so the
    # kernel/reference comparison stays tight.
    x = jax.random.normal(kx, (batch, in_features), dtype=jnp.float32)
    x = x.astype(jnp.bfloat16).astype(jnp.float32)
    w = jax.random.normal(kw, (1, in_features), dtype=jnp.float32) * 0.1
    w = w.astype(jnp.bfloat16).astype(jnp.float32)
    # or_bias: randn(nclass-1) sorted descending (as in __init__).
    or_bias = jnp.sort(
        jax.random.normal(kb, (nclass - 1,), dtype=jnp.float32))[::-1]

    # Single-block case (B <= tile): block dims equal the array dims.
    out = jax.block_until_ready(ornet_forward(x, w, or_bias))
    ref = ornet_reference(x, w, or_bias)
    assert out.shape == (batch, nclass)
    assert bool(jnp.allclose(out, ref, atol=1e-4, rtol=1e-3)), float(
        jnp.max(jnp.abs(out - ref)))

    # Multi-tile case: lane-dense (K, 128) output blocks, 4-step parallel grid.
    batch2 = 512
    x2 = jax.random.normal(jax.random.PRNGKey(1), (batch2, in_features),
                           dtype=jnp.float32)
    x2 = x2.astype(jnp.bfloat16).astype(jnp.float32)
    out2 = jax.block_until_ready(ornet_forward(x2, w, or_bias, tile_b=128))
    ref2 = ornet_reference(x2, w, or_bias)
    assert out2.shape == (batch2, nclass)
    assert bool(jnp.allclose(out2, ref2, atol=1e-4, rtol=1e-3)), float(
        jnp.max(jnp.abs(out2 - ref2)))

    print("KERNEL_OK")
</pallas_src>

<mosaic_0001>
module attributes {stable_mosaic.version = 11 : i64} {
  func.func @ornet_kernel(%arg0: i32, %arg1: memref<8x32xf32, #tpu.memory_space<vmem>>, %arg2: memref<8x32xf32, #tpu.memory_space<vmem>>, %arg3: memref<8x1xf32, #tpu.memory_space<vmem>>, %arg4: memref<5x8xf32, #tpu.memory_space<vmem>>, %arg5: memref<5x1xf32, #tpu.memory_space<vmem>>, %arg6: memref<5x8xf32, #tpu.memory_space<vmem>>) attributes {dimension_semantics = [#tpu.dimension_semantics<parallel>], iteration_bounds = array<i64: 1>, scalar_prefetch = 0 : i64, scratch_operands = 0 : i64, tpu.core_type = #tpu.core_type<tc>, window_params = [{transform_indices = @transform_0, window_bounds = array<i64: 8, 32>}, {pipeline_mode = #tpu.pipeline_mode<synchronous>, transform_indices = @transform_1, window_bounds = array<i64: 8, 32>}, {pipeline_mode = #tpu.pipeline_mode<synchronous>, transform_indices = @transform_2, window_bounds = array<i64: 8, 1>}, {pipeline_mode = #tpu.pipeline_mode<synchronous>, transform_indices = @transform_3, window_bounds = array<i64: 5, 8>}, {pipeline_mode = #tpu.pipeline_mode<synchronous>, transform_indices = @transform_4, window_bounds = array<i64: 5, 1>}, {transform_indices = @transform_5, window_bounds = array<i64: 5, 8>}]} {
    %c0 = arith.constant 0 : index
    %c0_0 = arith.constant 0 : index
    %0 = vector.load %arg1[%c0, %c0_0] : memref<8x32xf32, #tpu.memory_space<vmem>>, vector<8x32xf32>
    %c0_1 = arith.constant 0 : index
    %c0_2 = arith.constant 0 : index
    %1 = vector.load %arg2[%c0_1, %c0_2] : memref<8x32xf32, #tpu.memory_space<vmem>>, vector<8x32xf32>
    %c0_3 = arith.constant 0 : index
    %c0_4 = arith.constant 0 : index
    %2 = vector.load %arg3[%c0_3, %c0_4] : memref<8x1xf32, #tpu.memory_space<vmem>>, vector<8x1xf32>
    %c0_5 = arith.constant 0 : index
    %c0_6 = arith.constant 0 : index
    %3 = vector.load %arg4[%c0_5, %c0_6] : memref<5x8xf32, #tpu.memory_space<vmem>>, vector<5x8xf32>
    %c0_7 = arith.constant 0 : index
    %c0_8 = arith.constant 0 : index
    %4 = vector.load %arg5[%c0_7, %c0_8] : memref<5x1xf32, #tpu.memory_space<vmem>>, vector<5x1xf32>
    %cst = arith.constant dense<0.000000e+00> : vector<8x8xf32>
    %5 = tpu.matmul %1, %0, %cst {dimension_numbers = #tpu.dot_dimension_numbers<[1], [1], [0], [0], [0, 0, 1, 0], [], []>} : vector<8x32xf32>, vector<8x32xf32>, vector<8x8xf32> -> vector<8x8xf32>
    %6 = vector.broadcast %2 : vector<8x1xf32> to vector<8x8xf32>
    %7 = arith.addf %6, %5 : vector<8x8xf32>
    %8 = arith.negf %7 : vector<8x8xf32>
    %9 = math.exp %8 : vector<8x8xf32>
    %cst_9 = arith.constant 1.000000e+00 : f32
    %10 = vector.broadcast %cst_9 : f32 to vector<8x8xf32>
    %11 = arith.addf %10, %9 : vector<8x8xf32>
    %12 = arith.divf %10, %11 : vector<8x8xf32>
    %cst_10 = arith.constant dense<0.000000e+00> : vector<5x8xf32>
    %13 = tpu.matmul %3, %12, %cst_10 {dimension_numbers = #tpu.dot_dimension_numbers<[1], [0], [0], [1], [0, 0, 1, 1], [], []>} : vector<5x8xf32>, vector<8x8xf32>, vector<5x8xf32> -> vector<5x8xf32>
    %14 = vector.broadcast %4 : vector<5x1xf32> to vector<5x8xf32>
    %15 = arith.addf %13, %14 : vector<5x8xf32>
    %16 = math.log %15 : vector<5x8xf32>
    %cst_11 = arith.constant 1.000000e+00 : f32
    %17 = vector.broadcast %cst_11 : f32 to vector<5x8xf32>
    %18 = arith.subf %17, %15 : vector<5x8xf32>
    %19 = math.log %18 : vector<5x8xf32>
    %20 = arith.subf %16, %19 : vector<5x8xf32>
    %c0_12 = arith.constant 0 : index
    %c0_13 = arith.constant 0 : index
    %21 = vector.load %arg6[%c0_12, %c0_13] : memref<5x8xf32, #tpu.memory_space<vmem>>, vector<5x8xf32>
    tpu.vector_store %arg6[%c0_12, %c0_13], %20 {strides = array<i32>} : memref<5x8xf32, #tpu.memory_space<vmem>>, vector<5x8xf32>,
    return
  }
  func.func @transform_0(%arg0: i32) -> (i32, i32) {
    %c0_i32 = arith.constant 0 : i32
    %c0_i32_0 = arith.constant 0 : i32
    return %arg0, %c0_i32 : i32, i32
  }
  func.func @transform_1(%arg0: i32) -> (i32, i32) {
    %c0_i32 = arith.constant 0 : i32
    %c0_i32_0 = arith.constant 0 : i32
    %c0_i32_1 = arith.constant 0 : i32
    return %c0_i32, %c0_i32_0 : i32, i32
  }
  func.func @transform_2(%arg0: i32) -> (i32, i32) {
    %c0_i32 = arith.constant 0 : i32
    %c0_i32_0 = arith.constant 0 : i32
    %c0_i32_1 = arith.constant 0 : i32
    return %c0_i32, %c0_i32_0 : i32, i32
  }
  func.func @transform_3(%arg0: i32) -> (i32, i32) {
    %c0_i32 = arith.constant 0 : i32
    %c0_i32_0 = arith.constant 0 : i32
    %c0_i32_1 = arith.constant 0 : i32
    return %c0_i32, %c0_i32_0 : i32, i32
  }
  func.func @transform_4(%arg0: i32) -> (i32, i32) {
    %c0_i32 = arith.constant 0 : i32
    %c0_i32_0 = arith.constant 0 : i32
    %c0_i32_1 = arith.constant 0 : i32
    return %c0_i32, %c0_i32_0 : i32, i32
  }
  func.func @transform_5(%arg0: i32) -> (i32, i32) {
    %c0_i32 = arith.constant 0 : i32
    %c0_i32_0 = arith.constant 0 : i32
    return %c0_i32, %arg0 : i32, i32
  }
}

</mosaic_0001>

<bundles_post_ra>
// kernel: tpu_custom_call.1
= control target key start
LH: loop header
LB: loop body
LE: loop exit
PB: predicated region body
PF: predicated region fallthrough
CT: control target
= control target key end

     0   :  { %vm26_vm0 = vcmask 261120   ;;  %v271_v1 = vmov 0.0   ;;  %vm272_vm1 = vmmov 0   ;;  %s332_s0 = inlined_call_operand.vmem [shape: f32[8,32], index: 0, kind: input, shape index: {}]   ;;  %s333_s1 = inlined_call_operand.vmem [shape: f32[8,32], index: 1, kind: input, shape index: {}]   ;;  %s334_s2 = inlined_call_operand.vmem [shape: f32[8,1], index: 2, kind: input, shape index: {}]   ;;  %s335_s3 = inlined_call_operand.vmem [shape: f32[5,8], index: 3, kind: input, shape index: {}]   ;;  %s336_s4 = inlined_call_operand.vmem [shape: f32[5,1], index: 4, kind: input, shape index: {}]   ;;  %s337_s5 = inlined_call_operand.hbm [shape: f32[5,8], index: 5, kind: output, shape index: {}]  }
   0x1   :  { %v21_v0 = vld [vmem:[%s332_s0] sm:$0xff]  ;;  %224 = vmatprep.subr.mxu0 %v271_v1  ;;  %226 = vmatprep.mubr.msk.f32.mxu0 %vm272_vm1, %v271_v1 }
   0x2   :  { %v23_v2 = vld [vmem:[%s334_s2] sm:$0xff] }
   0x3   :  { %10 = vsyncpa [#allocation3], 0  ;;  %225 = vmatpush3.xpose.msk.msra.mxu0 %vm26_vm0, %v21_v0  ;;  %v22_v3 = vld [vmem:[%s333_s1] sm:$0xff]  ;;  %v273_v4 = vmov 0   ;;  %229 = vmatprep.subr.mxu1 %v271_v1  ;;  %vm120_vm2 = vcmask 64512   ;;  %vm200_vm3 = vcmask 61440  }
   0x4   :  { %238 = vset.pattern.permute.xlu0 %v273_v4  ;;  %v25_v5 = vld [vmem:[%s336_s4] sm:$0x1f]  ;;  %231 = vmatprep.mubr.msk.f32.mxu1 %vm272_vm1, %v271_v1  ;;  %s274_s4 = smov [#allocation2]  }
   0x5   :  { %105 = vperm.xlu0 %238, %v23_v2   ;;  %v24_v13 = vld [vmem:[%s335_s3] sm:$0x1f]  ;;  %s208_s25 = sshll.u32 %s274_s4, 4  ;;  %s209_s25 = int_to_ptr.vmem [resolvable:$true] %s208_s25 }
   0x6   :  { %227 = vmatmul.mubr.msk.f32.vlgmr.msra.gmra.mrb[0].mxu0 %vm26_vm0, %v22_v3  ;;  %s247_s3 = scalar_lea.vmem %s209_s25, 128  ;;  %p252_p1 = scmp.lt.s32.totalorder %s209_s25, %s209_s25 }
   0x7   :  { %p248_p0 = scmp.ne.s32.totalorder %s209_s25, %s247_s3  ;;  %p253_p2 = scmp.lt.s32.totalorder %s247_s3, %s247_s3 }
   0x9   :  { %117 = vperm.xlu0 %238, %v25_v5   ;;  %p254_p3 = por %p253_p2, %p252_p1 }
   0xb   :  { %p255_p4 = pnand %p254_p3, %p248_p0 }
  0x84   :  { %v106_v6 = vpop.permute.xlu0 %105 }
  0x88   :  { %v118_v15 = vpop.permute.xlu0 %117 }
  0xd9   :  { %v99_v7 = vpop.f32.mrb[0].mxu0 }
  0xda   :  { %v108_v8 = vadd.f32 %v106_v6, %v99_v7  ;;  %v228_v9 = vpop.f32.mrb[1].mxu0 }
  0xdc   :  { %v218_v10 = vmul.f32 -1.442695, %v108_v8 }
  0xde   :  { %239 = vpow2.f32 %v218_v10 }
  0xe8   :  { %v240_v11 = vpop.eup %239 }
  0xe9   :  { %v112_v12 = vadd.f32 1.0, %v240_v11 }
  0xeb   :  { %241 = vrcp.f32 %v112_v12 }
  0xf5   :  { %v242_v14 = vpop.eup %241 }
  0xf6   :  { %230 = vmatpush3.msra.mxu1 %v242_v14 }
  0xf7   :  { %232 = vmatmul.mubr.msk.f32.vlgmr.msra.gmra.mrb[0].mxu1 %vm120_vm2, %v24_v13 }
 0x1ca   :  { %v190_v16 = vpop.f32.mrb[0].mxu1 }
 0x1cb   :  { %v191_v17 = vadd.f32 %v190_v16, %v118_v15  ;;  %v233_v18 = vpop.f32.mrb[1].mxu1 }
 0x1cd   :  { %243 = vlog2.f32 %v191_v17  ;;  %v196_v19 = vsub.f32 1.0, %v191_v17 }
 0x1cf   :  { %245 = vlog2.f32 %v196_v19 }
 0x1d7   :  { %v244_v20 = vpop.eup %243 }
 0x1d8   :  { %v195_v22 = vmul.f32 0.6931472, %v244_v20 }
 0x1d9   :  { %v246_v21 = vpop.eup %245 }
 0x1da   :  { %v198_v23 = vmul.f32 0.6931472, %v246_v21 }
 0x1dc   :  { %v199_v24 = vsub.f32 %v195_v22, %v198_v23 }
 0x1de   :  { %201 = vst.msk [vmem:[#allocation2] sm:$0x1f] %vm200_vm3, %v199_v24 }
 0x1df   :  { %258 = shalt.err (!%p255_p4)
}
 0x1e0   :  { %s259_s28 = scalar_lea.hbm %s337_s5, 128 }
 0x1e1   :  { %p260_p5 = scmp.ne.s32.totalorder %s337_s5, %s259_s28  ;;  %p263_p6 = scmp.lt.u32.totalorder %s259_s28, %s337_s5 }
 0x1e3   :  { %p265_p7 = pnand %p263_p6, %p260_p5 }
 0x1e5   :  { %268 = shalt.err (!%p265_p7)
}
 0x1e6   :  { %211 = dma.vmem_to_hbm [thread:$0]  %s209_s25, 128, %s337_s5, [#allocation3]  }
 0x1e7   :  { %269 = dma.done.wait [#allocation3], 128  }
 0x1e8   :  { %270 = vsyncadd [#allocation3], 4294967168 }
 0x1e9   :  { %215 = vsyncpa [#allocation3], 1 }

</bundles_post_ra>
